<compile_context>
chip_gen: v7x
topology: tpu7x:2x2x1
jax: 0.10.0
libtpu: 0.0.40
codegen_flags: <defaults>
</compile_context>

<pallas_src>
import functools
import math

import jax
import jax.numpy as jnp
from jax.experimental import pallas as pl
from jax.experimental.pallas import tpu as pltpu

_SQRT_2_OVER_PI = math.sqrt(2.0 / math.pi)
_GELU_COEFF = 0.044715
_LANES = 128


def _chip_tuning():
    """Returns (target_block_bytes, vmem_limit_bytes, num_tensorcores, bf16_math_ok)."""
    kind = ""
    try:
        kind = jax.devices()[0].device_kind.lower()
    except Exception:  # no devices / unusual backend -> conservative defaults
        pass
    if "v7" in kind or "7x" in kind:
        # 64 MiB VMEM per TC, ~3.2 TB/s HBM, 2 TensorCores per chip.
        return 8 * 1024 * 1024, 48 * 1024 * 1024, 2, True
    if "v6" in kind:
        # 128 MiB physical VMEM, ~1.4 TB/s HBM, 1 TensorCore.
        return 8 * 1024 * 1024, 64 * 1024 * 1024, 1, True
    # v5e / v5p / v4 / unknown: conservative (v5e has no bf16 VPU/EUP).
    return 3 * 1024 * 1024, 32 * 1024 * 1024, 1, False


def _gelu_kernel(x_ref, o_ref, *, compute_dtype):
    x = x_ref[...].astype(compute_dtype)
    # Horner form x*(c0 + c1*x*x) == sqrt(2/pi)*(x + 0.044715*x^3); one fewer VALU op.
    t = jnp.tanh(x * (_SQRT_2_OVER_PI + (_SQRT_2_OVER_PI * _GELU_COEFF) * x * x))
    o_ref[...] = (0.5 * x * (1.0 + t)).astype(o_ref.dtype)


def _round_up(n: int, m: int) -> int:
    return ((n + m - 1) // m) * m


def _round_down(n: int, m: int) -> int:
    return (n // m) * m


def _choose_row_tile(rows: int, itemsize: int, target_block_bytes: int,
                     num_cores: int) -> int:
    """Dtype- and generation-aware row tile, ~target_block_bytes per block."""
    packing = max(1, 4 // itemsize)          # f32:1, bf16:2, int8/fp8:4
    sub = 8 * packing                        # sublane granularity for this dtype
    rt = max(sub, _round_down(target_block_bytes // (_LANES * itemsize), sub))
    rows_up = _round_up(rows, sub)
    rt = min(rt, rows_up)

    if num_cores > 1:
        # Give each TensorCore >= 2 grid steps when there is enough work, so
        # the double-buffered pipeline can overlap DMA with compute.
        min_blocks = 2 * num_cores
        if rows_up >= min_blocks * sub and pl.cdiv(rows, rt) < min_blocks:
            rt = max(sub, _round_down(rows_up // min_blocks, sub))
    return rt


def _gelu_jnp(x: jax.Array) -> jax.Array:
    """Plain-JAX fallback / reference (f32 opmath)."""
    xf = x.astype(jnp.float32)
    y = 0.5 * xf * (1.0 + jnp.tanh(_SQRT_2_OVER_PI * (xf + _GELU_COEFF * xf ** 3)))
    return y.astype(x.dtype)


def gelu(x: jax.Array) -> jax.Array:
    """Tanh-approx GELU (matches the PyTorch module). Elementwise, any shape."""
    # NOTE: this is the tanh approximation by spec (the module hard-codes it),
    # not nn.GELU's default erf formulation.
    orig_shape = x.shape
    orig_dtype = x.dtype
    total = x.size
    itemsize = jnp.dtype(orig_dtype).itemsize

    target_block_bytes, vmem_limit, num_cores, bf16_math_ok = _chip_tuning()

    compute_dtype = jnp.float32
    if orig_dtype == jnp.bfloat16 and bf16_math_ok:
        # bf16 VPU/EUP-native chips (v6e/v7x): halve per-vreg VALU cost so the
        # kernel stays HBM-bound at 3.2 TB/s.
        # TODO(synk): small accuracy delta vs f32 opmath (PyTorch upcasts).
        compute_dtype = jnp.bfloat16

    flat = x.reshape(-1)
    aligned = (total // _LANES) * _LANES
    if aligned == 0:
        # Tiny (<128 element) input: not worth a kernel launch.
        return _gelu_jnp(x)

    main = flat if aligned == total else flat[:aligned]
    rows = aligned // _LANES
    x2d = main.reshape(rows, _LANES)

    rt = _choose_row_tile(rows, itemsize, target_block_bytes, num_cores)
    grid = (pl.cdiv(rows, rt),)

    kernel = functools.partial(_gelu_kernel, compute_dtype=compute_dtype)
    out2d = pl.pallas_call(
        kernel,
        out_shape=jax.ShapeDtypeStruct((rows, _LANES), orig_dtype),
        grid_spec=pltpu.PrefetchScalarGridSpec(
            num_scalar_prefetch=0,
            grid=grid,
            in_specs=[pl.BlockSpec((rt, _LANES), lambda i: (i, 0))],
            out_specs=pl.BlockSpec((rt, _LANES), lambda i: (i, 0)),
        ),
        compiler_params=pltpu.CompilerParams(
            dimension_semantics=("parallel",),
            # 4x block (double-buffered in+out) stays well under this limit,
            # which itself stays under every generation's physical VMEM.
            vmem_limit_bytes=vmem_limit,
        ),
        cost_estimate=pl.CostEstimate(
            flops=8 * aligned,
            transcendentals=aligned,
            bytes_accessed=2 * aligned * itemsize,
        ),
        # NOTE: input_output_aliases={0: 0} would enable in-place update when
        # the caller donates x, but forces a defensive copy when it does not;
        # left off because donation is caller-dependent.
    )(x2d)

    out_flat = out2d.reshape(-1)
    if aligned != total:
        # <=127-element tail in plain jnp, instead of the old whole-array
        # pad + output-slice round trip (~3x HBM traffic on unaligned shapes).
        # TODO(synk): an in-kernel lane-masked tail store would also remove
        # the remaining concatenate copy.
        tail = _gelu_jnp(flat[aligned:])
        out_flat = jnp.concatenate([out_flat, tail])
    return out_flat.reshape(orig_shape)


if __name__ == "__main__":
    key = jax.random.PRNGKey(0)

    # NCHW input, as the PyTorch module would typically see.
    x = jax.random.normal(key, (2, 4, 16, 16), dtype=jnp.float32)
    y = jax.block_until_ready(gelu(x))
    y_ref = _gelu_jnp(x)
    assert y.shape == x.shape and y.dtype == x.dtype
    assert jnp.allclose(y, y_ref, atol=1e-5, rtol=1e-5)

    # Unaligned-total case exercises the aligned-prefix + jnp-tail path.
    x2 = jax.random.normal(jax.random.PRNGKey(1), (5, 131), dtype=jnp.float32)
    y2 = jax.block_until_ready(gelu(x2))
    assert jnp.allclose(y2, _gelu_jnp(x2), atol=1e-5, rtol=1e-5)

    print("KERNEL_OK")
</pallas_src>

<mosaic_0001>
module attributes {stable_mosaic.version = 11 : i64} {
  func.func @_gelu_kernel(%arg0: i32, %arg1: memref<16x128xf32, #tpu.memory_space<vmem>>, %arg2: memref<16x128xf32, #tpu.memory_space<vmem>>) attributes {dimension_semantics = [#tpu.dimension_semantics<parallel>], iteration_bounds = array<i64: 1>, scalar_prefetch = 0 : i64, scratch_operands = 0 : i64, tpu.core_type = #tpu.core_type<tc>, window_params = [{transform_indices = @transform_0, window_bounds = array<i64: 16, 128>}, {transform_indices = @transform_1, window_bounds = array<i64: 16, 128>}]} {
    %c0 = arith.constant 0 : index
    %c0_0 = arith.constant 0 : index
    %0 = vector.load %arg1[%c0, %c0_0] : memref<16x128xf32, #tpu.memory_space<vmem>>, vector<16x128xf32>
    %cst = arith.constant 0.0356774069 : f32
    %1 = vector.broadcast %cst : f32 to vector<16x128xf32>
    %2 = arith.mulf %1, %0 : vector<16x128xf32>
    %3 = arith.mulf %2, %0 : vector<16x128xf32>
    %cst_1 = arith.constant 0.797884583 : f32
    %4 = vector.broadcast %cst_1 : f32 to vector<16x128xf32>
    %5 = arith.addf %4, %3 : vector<16x128xf32>
    %6 = arith.mulf %0, %5 : vector<16x128xf32>
    %7 = math.tanh %6 : vector<16x128xf32>
    %cst_2 = arith.constant 5.000000e-01 : f32
    %8 = vector.broadcast %cst_2 : f32 to vector<16x128xf32>
    %9 = arith.mulf %8, %0 : vector<16x128xf32>
    %cst_3 = arith.constant 1.000000e+00 : f32
    %10 = vector.broadcast %cst_3 : f32 to vector<16x128xf32>
    %11 = arith.addf %10, %7 : vector<16x128xf32>
    %12 = arith.mulf %9, %11 : vector<16x128xf32>
    %c0_4 = arith.constant 0 : index
    %c0_5 = arith.constant 0 : index
    %13 = vector.load %arg2[%c0_4, %c0_5] : memref<16x128xf32, #tpu.memory_space<vmem>>, vector<16x128xf32>
    tpu.vector_store %arg2[%c0_4, %c0_5], %12 {strides = array<i32>} : memref<16x128xf32, #tpu.memory_space<vmem>>, vector<16x128xf32>,
    return
  }
  func.func @transform_0(%arg0: i32) -> (i32, i32) {
    %c0_i32 = arith.constant 0 : i32
    %c0_i32_0 = arith.constant 0 : i32
    return %arg0, %c0_i32 : i32, i32
  }
  func.func @transform_1(%arg0: i32) -> (i32, i32) {
    %c0_i32 = arith.constant 0 : i32
    %c0_i32_0 = arith.constant 0 : i32
    return %arg0, %c0_i32 : i32, i32
  }
}

</mosaic_0001>

<bundles_post_ra>
// kernel: tpu_custom_call.1
= control target key start
LH: loop header
LB: loop body
LE: loop exit
PB: predicated region body
PF: predicated region fallthrough
CT: control target
= control target key end

     0   :  { %6 = vsyncpa [#allocation3], 0  ;;  %s160_s0 = inlined_call_operand.hbm [shape: f32[16,128], index: 0, kind: input, shape index: {}]   ;;  %s161_s1 = inlined_call_operand.hbm [shape: f32[16,128], index: 1, kind: output, shape index: {}]  }
   0x1   :  { %7 = vsyncpa [#allocation4], 0  ;;  %s116_s6 = smov [#allocation2]   ;;  %s68_s10 = scalar_lea.hbm %s160_s0, 256 }
   0x2   :  { %s13_s7 = sshll.u32 %s116_s6, 4  ;;  %p69_p0 = scmp.ne.s32.totalorder %s160_s0, %s68_s10  ;;  %s14_s7 = int_to_ptr.vmem [resolvable:$true] %s13_s7 }
   0x3   :  { %p72_p1 = scmp.lt.u32.totalorder %s68_s10, %s160_s0 }
   0x5   :  { %p74_p2 = pnand %p72_p1, %p69_p0 }
   0x7   :  { %77 = shalt.err (!%p74_p2)
}
   0x8   :  { %s78_s15 = scalar_lea.vmem %s14_s7, 256  ;;  %p83_p4 = scmp.lt.s32.totalorder %s14_s7, %s14_s7 }
   0x9   :  { %p79_p3 = scmp.ne.s32.totalorder %s14_s7, %s78_s15  ;;  %p84_p5 = scmp.lt.s32.totalorder %s78_s15, %s78_s15 }
   0xb   :  { %p85_p6 = por %p84_p5, %p83_p4 }
   0xd   :  { %p86_p7 = pnand %p85_p6, %p79_p3 }
   0xf   :  { %89 = shalt.err (!%p86_p7)
}
  0x10   :  { %s117_s16 = smov 128   ;;  %s118_s17 = smov 8  }
  0x11   :  { %19 = dma.hbm_to_vmem [thread:$0]  %s160_s0, 256, %s14_s7, [#allocation3], %s117_s16, %s117_s16, %s118_s17  }
  0x12   :  { %112 = dma.done.wait [#allocation3], 256  }
  0x13   :  { %113 = vsyncadd [#allocation3], 4294967040  ;;  %v23_v0 = vld [vmem:[#allocation2] sm:$0xff]  ;;  %v24_v1 = vld [vmem:[#allocation2 + $0x8] sm:$0xff]  ;;  %s119_s0 = smov [#allocation5]  }
  0x14   :  { %v25_v2 = vmul.f32 0.035677407, %v23_v0  ;;  %v26_v3 = vmul.f32 0.035677407, %v24_v1  ;;  %v35_v10 = vmul.f32 0.5, %v23_v0  ;;  %v36_v12 = vmul.f32 0.5, %v24_v1 }
  0x15   :  { %s48_s20 = sshll.u32 %s119_s0, 4  ;;  %s49_s20 = int_to_ptr.vmem [resolvable:$true] %s48_s20 }
  0x16   :  { %v27_v4 = vmul.f32 %v25_v2, %v23_v0  ;;  %v28_v5 = vmul.f32 %v26_v3, %v24_v1  ;;  %s90_s21 = scalar_lea.vmem %s49_s20, 256  ;;  %p95_p9 = scmp.lt.s32.totalorder %s49_s20, %s49_s20 }
  0x17   :  { %p91_p8 = scmp.ne.s32.totalorder %s49_s20, %s90_s21  ;;  %p96_p10 = scmp.lt.s32.totalorder %s90_s21, %s90_s21 }
  0x18   :  { %v29_v6 = vadd.f32 0.7978846, %v27_v4  ;;  %v30_v7 = vadd.f32 0.7978846, %v28_v5 }
  0x19   :  { %p97_p11 = por %p96_p10, %p95_p9 }
  0x1a   :  { %v31_v8 = vmul.f32 %v29_v6, %v23_v0  ;;  %v32_v9 = vmul.f32 %v30_v7, %v24_v1 }
  0x1b   :  { %p98_p12 = pnand %p97_p11, %p91_p8 }
  0x1c   :  { %64 = vtanh.f32 %v31_v8 }
  0x1d   :  { %66 = vtanh.f32 %v32_v9 }
  0x26   :  { %v65_v11 = vpop.eup %64 }
  0x27   :  { %v67_v13 = vpop.eup %66  ;;  %v37_v14 = vadd.f32 1.0, %v65_v11 }
  0x28   :  { %v38_v15 = vadd.f32 1.0, %v67_v13 }
  0x29   :  { %v39_v16 = vmul.f32 %v37_v14, %v35_v10 }
  0x2a   :  { %v40_v17 = vmul.f32 %v38_v15, %v36_v12 }
  0x2b   :  { %41 = vst [vmem:[#allocation5] sm:$0xff] %v39_v16 }
  0x2c   :  { %42 = vst [vmem:[#allocation5 + $0x8] sm:$0xff] %v40_v17 }
  0x2d   :  { %101 = shalt.err (!%p98_p12)
}
  0x2e   :  { %s102_s24 = scalar_lea.hbm %s161_s1, 256 }
  0x2f   :  { %p103_p13 = scmp.ne.s32.totalorder %s161_s1, %s102_s24  ;;  %p106_p0 = scmp.lt.u32.totalorder %s102_s24, %s161_s1 }
  0x31   :  { %p108_p1 = pnand %p106_p0, %p103_p13 }
  0x33   :  { %111 = shalt.err (!%p108_p1)
}
  0x34   :  { %54 = dma.vmem_to_hbm [thread:$0]  %s49_s20, 256, %s161_s1, [#allocation4], %s117_s16, %s117_s16, %s118_s17  }
  0x35   :  { %114 = dma.done.wait [#allocation4], 256  }
  0x36   :  { %115 = vsyncadd [#allocation4], 4294967040 }
  0x37   :  { %58 = vsyncpa [#allocation3], 1 }
  0x38   :  { %59 = vsyncpa [#allocation4], 1 }

</bundles_post_ra>
